<compile_context>
chip_gen: v5e
topology: v5e:2x2
jax: 0.10.0
libtpu: 0.0.40
codegen_flags: <defaults>
</compile_context>

<pallas_src>
import functools
import math

import jax
import jax.numpy as jnp
from jax import lax
from jax.experimental import pallas as pl
from jax.experimental.pallas import tpu as pltpu

_LANES = 128
_SUBLANES = 8
_GAN_TYPES = ("vanilla", "lsgan", "wgan", "wgan_softplus", "hinge")


def _elementwise_loss(x, *, gan_type, target_val, for_real, for_disc):
    """Per-element loss in f32, compile-time specialized on the module config."""
    if gan_type == "vanilla":
        # BCEWithLogits(x, t) = max(x, 0) - x * t + log1p(exp(-|x|))
        return jnp.maximum(x, 0.0) - x * target_val + jnp.log1p(jnp.exp(-jnp.abs(x)))
    if gan_type == "lsgan":
        d = x - target_val
        return d * d
    if gan_type == "wgan":
        return -x if for_real else x
    if gan_type == "wgan_softplus":
        z = -x if for_real else x
        return jnp.maximum(z, 0.0) + jnp.log1p(jnp.exp(-jnp.abs(z)))   # softplus(z)
    if gan_type == "hinge":
        if for_disc:
            z = -x if for_real else x
            return jnp.maximum(1.0 + z, 0.0)                            # relu(1 + z)
        return -x
    raise NotImplementedError(f"GAN type {gan_type} is not implemented.")


def _gan_loss_kernel(x_ref, o_ref, *, gan_type, target_val, for_real, for_disc,
                     valid_rows_last):
    """One lane-dense (block_rows, 128) block -> one (8, 128) partial-sum slab."""
    x = x_ref[...].astype(jnp.float32)      # native-dtype stream; cast on VPU (free)
    br = x.shape[0]
    per = _elementwise_loss(x, gan_type=gan_type, target_val=target_val,
                            for_real=for_real, for_disc=for_disc)

    def fold(v):                             # (br, 128) -> (8, 128): vreg adds only
        return jnp.sum(v.reshape(br // _SUBLANES, _SUBLANES, _LANES), axis=0)

    if valid_rows_last is None:
        # Every block is fully valid: no mask anywhere on the hot path.
        o_ref[0] = fold(per)
    else:
        # Only the ragged final block (partial edge block, OOB rows undefined)
        # pays for the row mask.
        is_last = pl.program_id(0) == pl.num_programs(0) - 1

        @pl.when(is_last)
        def _():
            ridx = lax.broadcasted_iota(jnp.int32, per.shape, 0)
            o_ref[0] = fold(jnp.where(ridx < valid_rows_last, per, 0.0))

        @pl.when(jnp.logical_not(is_last))
        def _():
            o_ref[0] = fold(per)


@functools.lru_cache(maxsize=None)
def _build_gan_loss_fn(shape, dtype_name, gan_type, for_real, for_disc,
                       real_label_val, fake_label_val, loss_weight, max_block_rows):
    if gan_type not in _GAN_TYPES:
        raise NotImplementedError(f"GAN type {gan_type} is not implemented.")

    dtype = jnp.dtype(dtype_name)
    n = math.prod(shape)
    itemsize = dtype.itemsize
    # Minimum second-to-last tile: 8 rows (32-bit), 16 (16-bit), 32 (8-bit).
    row_align = _SUBLANES * max(1, 4 // itemsize)
    mbr = max(row_align, (int(max_block_rows) // row_align) * row_align)

    rows_needed = -(-n // _LANES)            # ceil(n / 128)
    if n % _LANES == 0 and rows_needed >= row_align:
        # Zero-copy path: contiguous reshape to (rows, 128) is metadata-only.
        rows_arr = rows_needed
        block_rows = min(mbr, (rows_arr // row_align) * row_align)
        grid = -(-rows_arr // block_rows)
        tail = rows_arr - (grid - 1) * block_rows
        valid_rows_last = None if tail == block_rows else tail
        pad_elems = 0
    else:
        # Ragged input: zero-pad only the flat tail so every block is fully valid;
        # the constant pad contribution (pad_elems * loss(0)) is subtracted later.
        block_rows = min(mbr, -(-rows_needed // row_align) * row_align)
        grid = -(-rows_needed // block_rows)
        rows_arr = grid * block_rows
        pad_elems = rows_arr * _LANES - n
        valid_rows_last = None

    if gan_type in ("wgan", "wgan_softplus"):
        target_val = 0.0                     # target is a bool for these types
    else:
        target_val = float(real_label_val if for_real else fake_label_val)

    # loss(0): value of the per-element loss at x == 0 (zero-pad correction).
    if gan_type == "vanilla":
        loss0 = math.log(2.0)
    elif gan_type == "lsgan":
        loss0 = target_val * target_val
    elif gan_type == "wgan":
        loss0 = 0.0
    elif gan_type == "wgan_softplus":
        loss0 = math.log(2.0)
    else:  # hinge
        loss0 = 1.0 if for_disc else 0.0

    # mean over the true element count; loss_weight only on the generator path.
    scale = (1.0 / n) * (1.0 if for_disc else loss_weight)

    kernel = functools.partial(
        _gan_loss_kernel, gan_type=gan_type, target_val=target_val,
        for_real=bool(for_real), for_disc=bool(for_disc),
        valid_rows_last=valid_rows_last)

    block_bytes = block_rows * _LANES * itemsize
    vmem_limit = int(max(32 << 20, 2 * block_bytes + (4 << 20)))

    pallas_fn = pl.pallas_call(
        kernel,
        out_shape=jax.ShapeDtypeStruct((grid, _SUBLANES, _LANES), jnp.float32),
        grid=(grid,),
        in_specs=[pl.BlockSpec((block_rows, _LANES), lambda i: (i, 0))],
        out_specs=pl.BlockSpec((1, _SUBLANES, _LANES), lambda i: (i, 0, 0)),
        compiler_params=pltpu.CompilerParams(
            # Pure map over blocks -> both TensorCores can take a share on v7x.
            dimension_semantics=("parallel",),
            vmem_limit_bytes=vmem_limit),
    )

    @jax.jit
    def fn(x):
        flat = jnp.ravel(x)                  # native dtype; no upcast in the wrapper
        if pad_elems:
            flat = jnp.pad(flat, (0, pad_elems))
        x2 = flat.reshape(rows_arr, _LANES)  # lane-dense (rows, 128) view
        partials = pallas_fn(x2)             # (grid, 8, 128) f32 partial sums
        total = jnp.sum(partials, dtype=jnp.float32)
        return ((total - jnp.float32(pad_elems * loss0))
                * jnp.float32(scale)).astype(jnp.float32)

    return fn


def gan_loss_forward(x, gan_type, for_real, for_disc=False, *, real_label_val=1.0,
                     fake_label_val=0.0, loss_weight=1.0, max_block_rows=16384):
    """Pallas implementation of GANLoss(gan_type, ...).forward(x, for_real, for_disc)."""
    fn = _build_gan_loss_fn(tuple(x.shape), jnp.dtype(x.dtype).name, str(gan_type),
                            bool(for_real), bool(for_disc), float(real_label_val),
                            float(fake_label_val), float(loss_weight),
                            int(max_block_rows))
    return fn(x)


# ----------------------------- pure-JAX reference ----------------------------
def gan_loss_ref(x, gan_type, for_real, for_disc=False, *,
                 real_label_val=1.0, fake_label_val=0.0, loss_weight=1.0):
    x = x.astype(jnp.float32)
    if gan_type == "hinge":
        if for_disc:
            z = -x if for_real else x
            loss = jnp.mean(jax.nn.relu(1.0 + z))
        else:
            loss = -jnp.mean(x)
    elif gan_type == "wgan":
        loss = -jnp.mean(x) if for_real else jnp.mean(x)
    elif gan_type == "wgan_softplus":
        loss = (jnp.mean(jax.nn.softplus(-x)) if for_real
                else jnp.mean(jax.nn.softplus(x)))
    else:
        t = real_label_val if for_real else fake_label_val
        if gan_type == "vanilla":    # BCEWithLogitsLoss (mean)
            loss = jnp.mean(jnp.maximum(x, 0.0) - x * t
                            + jnp.log1p(jnp.exp(-jnp.abs(x))))
        elif gan_type == "lsgan":    # MSELoss (mean)
            loss = jnp.mean((x - t) ** 2)
        else:
            raise NotImplementedError(gan_type)
    return loss if for_disc else loss * loss_weight


if __name__ == "__main__":
    key = jax.random.PRNGKey(0)
    # PatchGAN-style discriminator logit maps, exercising all tiling paths:
    #   (2,1,16,16): n=512   -> ragged (rows < 8): tail zero-pad + loss(0) correction
    #   (2,4,16,16): n=2048  -> zero-copy, single full block, no mask
    #   (3,1,16,32): n=1536  -> zero-copy, 2 blocks, masked ragged last block
    cases = [(2, 1, 16, 16), (2, 4, 16, 16), (3, 1, 16, 32)]
    loss_weight = 0.7   # exercise the generator-path scaling
    all_ok = True
    for shape in cases:
        key, sub = jax.random.split(key)
        x_f32 = jax.random.normal(sub, shape, jnp.float32)
        for dtype in (jnp.float32, jnp.bfloat16):
            xt = x_f32.astype(dtype)
            for gan_type in _GAN_TYPES:
                for for_real in (True, False):
                    for for_disc in (True, False):
                        got = jax.block_until_ready(
                            gan_loss_forward(xt, gan_type, for_real, for_disc,
                                             loss_weight=loss_weight))
                        ref = gan_loss_ref(xt, gan_type, for_real, for_disc,
                                           loss_weight=loss_weight)
                        if not jnp.allclose(got, ref, rtol=1e-5, atol=1e-5):
                            all_ok = False
                            print(f"MISMATCH shape={shape} dtype={jnp.dtype(dtype).name} "
                                  f"{gan_type} real={for_real} disc={for_disc}: "
                                  f"{float(got)} vs {float(ref)}")

    assert all_ok, "GANLoss kernel does not match reference"
    print("KERNEL_OK")
</pallas_src>

<mosaic_0001>
module attributes {stable_mosaic.version = 11 : i64} {
  func.func @_gan_loss_kernel(%arg0: i32, %arg1: memref<8x128xf32, #tpu.memory_space<vmem>>, %arg2: memref<1x8x128xf32, #tpu.memory_space<vmem>>) attributes {dimension_semantics = [#tpu.dimension_semantics<parallel>], iteration_bounds = array<i64: 1>, scalar_prefetch = 0 : i64, scratch_operands = 0 : i64, tpu.core_type = #tpu.core_type<tc>, window_params = [{transform_indices = @transform_0, window_bounds = array<i64: 8, 128>}, {transform_indices = @transform_1, window_bounds = array<i64: 1, 8, 128>}]} {
    %c0 = arith.constant 0 : index
    %c0_0 = arith.constant 0 : index
    %0 = vector.load %arg1[%c0, %c0_0] : memref<8x128xf32, #tpu.memory_space<vmem>>, vector<8x128xf32>
    %cst = arith.constant 0.000000e+00 : f32
    %1 = vector.broadcast %cst : f32 to vector<8x128xf32>
    %2 = arith.maximumf %0, %1 : vector<8x128xf32>
    %cst_1 = arith.constant 1.000000e+00 : f32
    %3 = vector.broadcast %cst_1 : f32 to vector<8x128xf32>
    %4 = arith.mulf %0, %3 : vector<8x128xf32>
    %5 = arith.subf %2, %4 : vector<8x128xf32>
    %6 = math.absf %0 : vector<8x128xf32>
    %cst_2 = arith.constant 0.000000e+00 : f32
    %7 = vector.broadcast %cst_2 : f32 to vector<8x128xf32>
    %8 = arith.subf %7, %6 : vector<8x128xf32>
    %9 = math.exp %8 : vector<8x128xf32>
    %10 = math.log1p %9 : vector<8x128xf32>
    %11 = arith.addf %5, %10 : vector<8x128xf32>
    %12 = vector.shape_cast %11 : vector<8x128xf32> to vector<1x8x128xf32>
    %cst_3 = arith.constant dense<0.000000e+00> : vector<8x128xf32>
    %13 = vector.multi_reduction <add>, %12, %cst_3 [0] : vector<1x8x128xf32> to vector<8x128xf32>
    %c0_4 = arith.constant 0 : index
    %c0_5 = arith.constant 0 : index
    %c0_6 = arith.constant 0 : index
    %14 = vector.load %arg2[%c0_4, %c0_5, %c0_6] : memref<1x8x128xf32, #tpu.memory_space<vmem>>, vector<1x8x128xf32>
    %15 = vector.shape_cast %14 : vector<1x8x128xf32> to vector<8x128xf32>
    %16 = vector.shape_cast %13 : vector<8x128xf32> to vector<1x8x128xf32>
    tpu.vector_store %arg2[%c0_4, %c0_5, %c0_6], %16 {strides = array<i32>} : memref<1x8x128xf32, #tpu.memory_space<vmem>>, vector<1x8x128xf32>,
    return
  }
  func.func @transform_0(%arg0: i32) -> (i32, i32) {
    %c0_i32 = arith.constant 0 : i32
    %c0_i32_0 = arith.constant 0 : i32
    return %arg0, %c0_i32 : i32, i32
  }
  func.func @transform_1(%arg0: i32) -> (i32, i32, i32) {
    %c0_i32 = arith.constant 0 : i32
    %c0_i32_0 = arith.constant 0 : i32
    %c0_i32_1 = arith.constant 0 : i32
    return %arg0, %c0_i32, %c0_i32_0 : i32, i32, i32
  }
}

</mosaic_0001>

<bundles_post_ra>
// kernel: fn.1
= control target key start
LH: loop header
LB: loop body
LE: loop exit
PB: predicated region body
PF: predicated region fallthrough
CT: control target
= control target key end

     0   :  { %s51_s0 = inlined_call_operand.vmem [shape: f32[8,128], index: 0, kind: input, shape index: {}]   ;;  %s52_s1 = inlined_call_operand.vmem [shape: f32[1,8,128], index: 1, kind: output, shape index: {}]  }
   0x1   :  { %v8_v0 = vld [vmem:[%s51_s0] sm:$0xff] }
   0x2   :  { %v11_v1 = vand.u32 2147483647, %v8_v0  ;;  %v9_v8 = vmax.f32 %v8_v0, 0.0 }
   0x4   :  { %v12_v2 = vsub.f32 0.0, %v11_v1  ;;  %v10_v12 = vsub.f32 %v9_v8, %v8_v0 }
   0x6   :  { %v13_v3 = vmul.f32 1.442695, %v12_v2 }
   0x8   :  { %31 = vpow2.f32 %v13_v3 }
   0xe   :  { %v32_v4 = vpop.eup %31 }
   0xf   :  { %v15_v5 = vadd.f32 1.0, %v32_v4  ;;  %v18_v6 = vmul.f32 -0.5, %v32_v4  ;;  %v21_v9 = vand.u32 2147483647, %v32_v4 }
  0x11   :  { %33 = vlog2.f32 %v15_v5  ;;  %v19_v7 = vadd.f32 1.0, %v18_v6  ;;  %vm22_vm0 = vcmp.lt.f32.partialorder %v21_v9, 0.0004427343 }
  0x13   :  { %v20_v10 = vmul.f32 %v32_v4, %v19_v7 }
  0x17   :  { %v34_v11 = vpop.eup %33 }
  0x18   :  { %v17_v13 = vmul.f32 0.6931472, %v34_v11 }
  0x1a   :  { %v23_v14 = vsel %vm22_vm0, %v20_v10, %v17_v13 }
  0x1b   :  { %v24_v15 = vadd.f32 %v23_v14, %v10_v12 }
  0x1d   :  { %26 = vst [vmem:[%s52_s1] sm:$0xff] %v24_v15 }

</bundles_post_ra>
